<compile_context>
chip_gen: v6e
topology: v6e:2x2x1
jax: 0.10.0
libtpu: 0.0.40
codegen_flags: <defaults>
</compile_context>

<pallas_src>
import functools
import math
from typing import NamedTuple

import jax
import jax.numpy as jnp
from jax.experimental import pallas as pl
from jax.experimental.pallas import tpu as pltpu


class SynthesizerOutput(NamedTuple):
    feedback: jax.Array
    reconstruction: jax.Array
    feedback_type: str


# ----------------------------------------------------------------------------
# Pallas kernel (optional explicit op-boundary; NOT on the default hot path).
# ----------------------------------------------------------------------------
def _synth_prompt_identity_kernel(prompt_ref, out_ref):
    # Pure pass-through of the prompt parameter — exactly what the PyTorch
    # module returns. Single grid-free VMEM tile; with the donated + aliased
    # buffer this is an in-place no-op at the HBM level.
    out_ref[...] = prompt_ref[...]


@functools.partial(jax.jit, donate_argnums=0)
def _prompt_passthrough_pallas(prompt: jax.Array) -> jax.Array:
    """Identity of `prompt` through a Pallas op boundary.

    NOTE: `prompt` is DONATED — the caller must not reuse the argument buffer
    afterwards. Donation makes input_output_aliases={0: 0} a real in-place
    alias (no defensive copy inserted by XLA).
    """
    n, d = prompt.shape
    # Lane-dense presentation: last dim a multiple of 128 -> unmasked vld/vst.
    if (n * d) % 128 == 0:
        work = prompt.reshape(1, n * d)          # bitcast-level reshape
    else:
        work = prompt
    out = pl.pallas_call(
        _synth_prompt_identity_kernel,
        out_shape=jax.ShapeDtypeStruct(work.shape, work.dtype),
        # Whole array resident in VMEM; no grid, single invocation.
        in_specs=[pl.BlockSpec(memory_space=pltpu.MemorySpace.VMEM)],
        out_specs=pl.BlockSpec(memory_space=pltpu.MemorySpace.VMEM),
        # prompt -> output alias; real (in-place) because the arg is donated.
        input_output_aliases={0: 0},
    )(work)
    return out.reshape(n, d)


# ----------------------------------------------------------------------------
# Module forward.
# ----------------------------------------------------------------------------
def synth_prompt_forward(prompt: jax.Array, x: jax.Array,
                         feedback_type: str = "v") -> SynthesizerOutput:
    """Perf-optimal Pallas-free forward (matches PyTorch semantics exactly).

    prompt: (N, D) float32 parameter.
    x:      (B, C, H, W). In PyTorch only x.shape[0] is consumed, and only to
            build a `repeat` tensor that is immediately discarded, so x
            contributes nothing to the outputs. If a batched (B, N, D) tensor
            were ever needed, use jnp.broadcast_to(prompt, (x.shape[0], N, D)).
    """
    del x
    return SynthesizerOutput(feedback=prompt,
                             reconstruction=prompt,
                             feedback_type=feedback_type)


def synth_prompt_forward_pallas_boundary(prompt: jax.Array, x: jax.Array,
                                         feedback_type: str = "v"
                                         ) -> SynthesizerOutput:
    """Same semantics, but routes the prompt through the Pallas identity kernel.

    Only use this if an explicit custom-call boundary is required; it DONATES
    the `prompt` buffer (pass a copy if you still need the original handle).
    """
    del x
    out = _prompt_passthrough_pallas(prompt)
    return SynthesizerOutput(feedback=out,
                             reconstruction=out,
                             feedback_type=feedback_type)


def init_synth_prompt_params(key, feat_shape: int, feat_dim: int) -> jax.Array:
    """nn.Parameter(torch.randn(feat_shape, feat_dim)) + xavier_uniform_."""
    # xavier_uniform_: U(-a, a), a = sqrt(6 / (fan_in + fan_out)).
    # For a 2D tensor (feat_shape, feat_dim): fan_in = feat_dim, fan_out = feat_shape.
    a = math.sqrt(6.0 / (feat_dim + feat_shape))
    return jax.random.uniform(key, (feat_shape, feat_dim),
                              dtype=jnp.float32, minval=-a, maxval=a)


if __name__ == "__main__":
    key = jax.random.PRNGKey(0)
    k_prompt, k_x = jax.random.split(key)

    batch, channels, spatial = 2, 4, 16
    feat_shape, feat_dim = 8, 32          # N prompt tokens, hidden dim

    prompt = init_synth_prompt_params(k_prompt, feat_shape, feat_dim)
    x = jax.random.normal(k_x, (batch, channels, spatial, spatial),
                          dtype=jnp.float32)

    # --- Default (perf-optimal) forward: pure identity, no kernel launch. ---
    out = synth_prompt_forward(prompt, x, feedback_type="v")
    jax.block_until_ready(out.feedback)
    assert out.feedback.shape == (feat_shape, feat_dim)
    assert out.reconstruction.shape == (feat_shape, feat_dim)
    assert bool(jnp.allclose(out.feedback, prompt))
    assert bool(jnp.allclose(out.reconstruction, prompt))
    assert out.feedback_type == "v"

    # --- Pallas explicit-boundary variant: run the kernel once on TPU. ------
    # The passthrough donates its argument, so hand it a fresh device copy and
    # keep `prompt` for the correctness comparison.
    prompt_copy = jnp.array(prompt, copy=True)
    out_k = synth_prompt_forward_pallas_boundary(prompt_copy, x, feedback_type="v")
    jax.block_until_ready(out_k.feedback)
    jax.block_until_ready(out_k.reconstruction)
    assert out_k.feedback.shape == (feat_shape, feat_dim)
    assert bool(jnp.allclose(out_k.feedback, prompt))
    assert bool(jnp.allclose(out_k.reconstruction, prompt))
    assert out_k.feedback_type == "v"

    print("KERNEL_OK")
</pallas_src>

<mosaic_0001>
module attributes {stable_mosaic.version = 11 : i64} {
  func.func @_synth_prompt_identity_kernel(%arg0: memref<1x256xf32, #tpu.memory_space<vmem>>, %arg1: memref<1x256xf32, #tpu.memory_space<vmem>>) attributes {dimension_semantics = [], scalar_prefetch = 0 : i64, scratch_operands = 0 : i64, tpu.core_type = #tpu.core_type<tc>} {
    %c0 = arith.constant 0 : index
    %c0_0 = arith.constant 0 : index
    %0 = vector.load %arg0[%c0, %c0_0] : memref<1x256xf32, #tpu.memory_space<vmem>>, vector<1x256xf32>
    %c0_1 = arith.constant 0 : index
    %c0_2 = arith.constant 0 : index
    %1 = vector.load %arg1[%c0_1, %c0_2] : memref<1x256xf32, #tpu.memory_space<vmem>>, vector<1x256xf32>
    tpu.vector_store %arg1[%c0_1, %c0_2], %0 {strides = array<i32>} : memref<1x256xf32, #tpu.memory_space<vmem>>, vector<1x256xf32>,
    return
  }
}

</mosaic_0001>

<bundles_post_ra>
// kernel: _prompt_passthrough_pallas.1
= control target key start
LH: loop header
LB: loop body
LE: loop exit
PB: predicated region body
PF: predicated region fallthrough
CT: control target
= control target key end

     0   :  { %v9_v0 = vlaneseq  ;;  %s34_s0 = inlined_call_operand.vmem [shape: f32[1,256], index: 0, kind: input, shape index: {}, may-alias: {0,1}]   ;;  %s35_s1 = inlined_call_operand.vmem [shape: f32[1,256], index: 1, kind: output, shape index: {}, may-alias: {0,1}]  }
   0x1   :  { %v8_v1 = vld [vmem:[%s34_s0] sm:$0x3] }
   0x2   :  { %vm11_vm0 = vcmp.lt.s32.totalorder %v9_v0, 256 }
   0x3   :  { %13 = vst.msk [vmem:[%s35_s1] sm:$0x3] %vm11_vm0, %v8_v1 }

</bundles_post_ra>
